<compile_context>
chip_gen: v6e
topology: v6e:2x2x1
jax: 0.10.0
libtpu: 0.0.40
codegen_flags: <defaults>
</compile_context>

<pallas_src>
import functools

import jax
import jax.numpy as jnp
from jax import lax
from jax.experimental import pallas as pl
from jax.experimental.pallas import tpu as pltpu


# ----------------------------- kernels ---------------------------------------


def _linear_kernel_acc_in_out(x_ref, w_ref, b_ref, o_ref):
    """o = x @ w + b, accumulated directly into the f32 output block over the k axis."""
    k = pl.program_id(2)

    @pl.when(k == 0)
    def _init():
        o_ref[...] = jnp.zeros_like(o_ref)

    o_ref[...] += jnp.dot(x_ref[...], w_ref[...], preferred_element_type=jnp.float32)

    @pl.when(k == pl.num_programs(2) - 1)
    def _finalize():
        o_ref[...] += b_ref[...].astype(o_ref.dtype)


def _linear_kernel_scratch(x_ref, w_ref, b_ref, o_ref, acc_ref):
    """Same as above, but with an f32 scratch accumulator for narrow output dtypes."""
    k = pl.program_id(2)

    @pl.when(k == 0)
    def _init():
        acc_ref[...] = jnp.zeros_like(acc_ref)

    acc_ref[...] += jnp.dot(x_ref[...], w_ref[...], preferred_element_type=jnp.float32)

    @pl.when(k == pl.num_programs(2) - 1)
    def _finalize():
        o_ref[...] = (acc_ref[...] + b_ref[...]).astype(o_ref.dtype)


# ----------------------------- tiling helpers ---------------------------------


def _round_up(x, m):
    return ((x + m - 1) // m) * m


def _pick_tile(dim, target, align):
    """Pick (tile, padded_dim).  `tile` is a multiple of `align`, bounded by the target,
    and always divides `padded_dim` (which is >= dim with bounded zero-padding)."""
    target = max(align, (target // align) * align)
    if dim <= target:
        t = _round_up(dim, align)
        return t, t
    # Prefer an aligned divisor of `dim` near the target (no padding at all).
    t = target
    while t >= align:
        if dim % t == 0:
            if t * 2 > target:          # only accept divisors >= target/2
                return t, dim
            break
        t -= align
    # Otherwise pad `dim` up to a multiple of the target tile (waste < one tile).
    return target, _round_up(dim, target)


# ----------------------------- wrapper ----------------------------------------


@functools.partial(jax.jit, static_argnames=("tm", "tn", "tk", "mxu_dtype"))
def lr_forward(x, weight, bias, *, tm=512, tn=512, tk=1024, mxu_dtype=None):
    """x: (B, D_in); weight: (D_out, D_in) (PyTorch layout); bias: (D_out,).

    mxu_dtype: optional narrower MXU input dtype (e.g. jnp.bfloat16).  Operands are cast
    once in the wrapper so HBM traffic and VMEM tiles shrink; accumulation stays f32.
    """
    B, D_in = x.shape
    D_out = weight.shape[0]
    out_dtype = x.dtype

    in_dtype = jnp.dtype(mxu_dtype) if mxu_dtype is not None else jnp.dtype(x.dtype)
    # Min sublane tile: 8 for 4-byte, 16 for 2-byte, 32 for 1-byte dtypes.
    sub_align = max(8, 32 // in_dtype.itemsize)

    tm, Mp = _pick_tile(B, tm, sub_align)
    tn, Np = _pick_tile(D_out, tn, 128)
    tk, Kp = _pick_tile(D_in, tk, 128)
    grid = (Mp // tm, Np // tn, Kp // tk)

    # One-time operand prep (cast / transpose / pad).  In a real model the weight
    # transpose + cast should be done at parameter-load time, not per forward call.
    xk = x.astype(in_dtype)
    wk = weight.astype(in_dtype).T                     # (D_in, D_out): MXU-native layout
    bk = bias.astype(jnp.float32).reshape(1, D_out)
    if (Mp, Kp) != (B, D_in):
        xk = jnp.pad(xk, ((0, Mp - B), (0, Kp - D_in)))
    if (Kp, Np) != (D_in, D_out):
        wk = jnp.pad(wk, ((0, Kp - D_in), (0, Np - D_out)))
    if Np != D_out:
        bk = jnp.pad(bk, ((0, 0), (0, Np - D_out)))

    # f32 output => accumulate straight into the output block (it is VMEM-resident
    # across the k axis); otherwise keep an f32 scratch accumulator.
    acc_in_out = out_dtype == jnp.float32
    kernel = _linear_kernel_acc_in_out if acc_in_out else _linear_kernel_scratch
    scratch = [] if acc_in_out else [pltpu.VMEM((tm, tn), jnp.float32)]

    # VMEM budget: double-buffered inputs + double-buffered output (+ scratch), capped at
    # 64 MiB so the same setting is legal on v7x while exceeding v5e/v6e scoped defaults.
    in_bytes = in_dtype.itemsize
    out_bytes = jnp.dtype(out_dtype).itemsize
    est_vmem = (2 * (tm * tk + tk * tn) * in_bytes
                + 2 * (tm * tn * out_bytes + tn * 4)
                + (0 if acc_in_out else tm * tn * 4))
    vmem_limit = min(64 * 1024 * 1024, max(32 * 1024 * 1024, int(est_vmem * 3 // 2)))

    cost = pl.CostEstimate(
        flops=2 * Mp * Np * Kp,
        transcendentals=0,
        bytes_accessed=int(in_bytes * (Mp * Kp * grid[1] + Kp * Np * grid[0])
                           + out_bytes * Mp * Np + 4 * Np),
    )

    out = pl.pallas_call(
        kernel,
        out_shape=jax.ShapeDtypeStruct((Mp, Np), out_dtype),
        grid=grid,
        in_specs=[
            pl.BlockSpec((tm, tk), lambda i, j, k: (i, k)),   # activation tile
            pl.BlockSpec((tk, tn), lambda i, j, k: (k, j)),   # pre-transposed weight tile
            pl.BlockSpec((1, tn), lambda i, j, k: (0, j)),    # bias tile (n-indexed only)
        ],
        out_specs=pl.BlockSpec((tm, tn), lambda i, j, k: (i, j)),
        scratch_shapes=scratch,
        compiler_params=pltpu.CompilerParams(
            dimension_semantics=("parallel", "parallel", "arbitrary"),
            vmem_limit_bytes=vmem_limit,
        ),
        cost_estimate=cost,
    )(xk, wk, bk)

    if (Mp, Np) != (B, D_out):
        out = out[:B, :D_out]
    return out


# ----------------------------- demo / checks ----------------------------------


if __name__ == "__main__":
    # ---- Small shapes consistent with the multiple-output LR module ----
    batch, input_size, output_size = 8, 4, 2

    key = jax.random.PRNGKey(0)
    kx, kw, kb = jax.random.split(key, 3)

    x = jax.random.normal(kx, (batch, input_size), dtype=jnp.float32)

    # Deterministic parameter init mimicking torch.nn.Linear (uniform +/- 1/sqrt(in)).
    bound = 1.0 / (input_size ** 0.5)
    weight = jax.random.uniform(kw, (output_size, input_size),
                                minval=-bound, maxval=bound, dtype=jnp.float32)
    bias = jax.random.uniform(kb, (output_size,),
                              minval=-bound, maxval=bound, dtype=jnp.float32)

    y = lr_forward(x, weight, bias)
    jax.block_until_ready(y)
    y_ref = x @ weight.T + bias
    assert y.shape == (batch, output_size)
    assert jnp.allclose(y, y_ref, atol=1e-5, rtol=1e-5)

    # ---- Scaled-up f32 check (single large tile per axis) ----
    M, K, N = 512, 1024, 384
    kx2, kw2, kb2 = jax.random.split(jax.random.PRNGKey(1), 3)
    x2 = jax.random.normal(kx2, (M, K), dtype=jnp.float32)
    w2 = jax.random.normal(kw2, (N, K), dtype=jnp.float32) / (K ** 0.5)
    b2 = jax.random.normal(kb2, (N,), dtype=jnp.float32)

    y2 = lr_forward(x2, w2, b2)
    jax.block_until_ready(y2)
    y2_ref = jnp.dot(x2, w2.T, precision=lax.Precision.HIGHEST) + b2
    assert jnp.allclose(y2, y2_ref, atol=1e-3, rtol=1e-3)

    # ---- bf16-fed-MXU check (multi-step k reduction), compared against a bf16 reference ----
    M3, K3, N3 = 512, 2048, 768
    kx3, kw3, kb3 = jax.random.split(jax.random.PRNGKey(2), 3)
    x3 = jax.random.normal(kx3, (M3, K3), dtype=jnp.float32)
    w3 = jax.random.normal(kw3, (N3, K3), dtype=jnp.float32) / (K3 ** 0.5)
    b3 = jax.random.normal(kb3, (N3,), dtype=jnp.float32)

    y3 = lr_forward(x3, w3, b3, mxu_dtype=jnp.bfloat16)
    jax.block_until_ready(y3)
    y3_ref = jnp.dot(x3.astype(jnp.bfloat16), w3.T.astype(jnp.bfloat16),
                     preferred_element_type=jnp.float32) + b3
    assert jnp.allclose(y3, y3_ref, atol=1e-2, rtol=1e-2)

    # ---- Awkward (non-aligned) dims exercising the zero-padding path ----
    M4, K4, N4 = 200, 260, 70
    kx4, kw4, kb4 = jax.random.split(jax.random.PRNGKey(3), 3)
    x4 = jax.random.normal(kx4, (M4, K4), dtype=jnp.float32)
    w4 = jax.random.normal(kw4, (N4, K4), dtype=jnp.float32) / (K4 ** 0.5)
    b4 = jax.random.normal(kb4, (N4,), dtype=jnp.float32)

    y4 = lr_forward(x4, w4, b4)
    jax.block_until_ready(y4)
    y4_ref = jnp.dot(x4, w4.T, precision=lax.Precision.HIGHEST) + b4
    assert y4.shape == (M4, N4)
    assert jnp.allclose(y4, y4_ref, atol=1e-4, rtol=1e-4)

    print("KERNEL_OK")
</pallas_src>

<mosaic_0001>
module attributes {stable_mosaic.version = 11 : i64} {
  func.func @_linear_kernel_acc_in_out(%arg0: i32, %arg1: i32, %arg2: i32, %arg3: memref<8x128xf32, #tpu.memory_space<vmem>>, %arg4: memref<128x128xf32, #tpu.memory_space<vmem>>, %arg5: memref<1x128xf32, #tpu.memory_space<vmem>>, %arg6: memref<8x128xf32, #tpu.memory_space<vmem>>) attributes {dimension_semantics = [#tpu.dimension_semantics<parallel>, #tpu.dimension_semantics<parallel>, #tpu.dimension_semantics<arbitrary>], iteration_bounds = array<i64: 1, 1, 1>, scalar_prefetch = 0 : i64, scratch_operands = 0 : i64, tpu.core_type = #tpu.core_type<tc>, window_params = [{transform_indices = @transform_0, window_bounds = array<i64: 8, 128>}, {transform_indices = @transform_1, window_bounds = array<i64: 128, 128>}, {transform_indices = @transform_2, window_bounds = array<i64: 1, 128>}, {transform_indices = @transform_3, window_bounds = array<i64: 8, 128>}]} {
    %c0_i32 = arith.constant 0 : i32
    %0 = arith.cmpi eq, %arg2, %c0_i32 : i32
    %1 = arith.extui %0 : i1 to i32
    %c0_i32_0 = arith.constant 0 : i32
    %2 = arith.cmpi ne, %1, %c0_i32_0 : i32
    scf.if %2 {
      %cst_10 = arith.constant 0.000000e+00 : f32
      %12 = vector.broadcast %cst_10 : f32 to vector<8x128xf32>
      %c0_11 = arith.constant 0 : index
      %c0_12 = arith.constant 0 : index
      %13 = vector.load %arg6[%c0_11, %c0_12] : memref<8x128xf32, #tpu.memory_space<vmem>>, vector<8x128xf32>
      tpu.vector_store %arg6[%c0_11, %c0_12], %12 {strides = array<i32>} : memref<8x128xf32, #tpu.memory_space<vmem>>, vector<8x128xf32>,
    } else {
    }
    %c0 = arith.constant 0 : index
    %c0_1 = arith.constant 0 : index
    %3 = vector.load %arg6[%c0, %c0_1] : memref<8x128xf32, #tpu.memory_space<vmem>>, vector<8x128xf32>
    %c0_2 = arith.constant 0 : index
    %c0_3 = arith.constant 0 : index
    %4 = vector.load %arg3[%c0_2, %c0_3] : memref<8x128xf32, #tpu.memory_space<vmem>>, vector<8x128xf32>
    %c0_4 = arith.constant 0 : index
    %c0_5 = arith.constant 0 : index
    %5 = vector.load %arg4[%c0_4, %c0_5] : memref<128x128xf32, #tpu.memory_space<vmem>>, vector<128x128xf32>
    %cst = arith.constant dense<0.000000e+00> : vector<8x128xf32>
    %6 = tpu.matmul %4, %5, %cst {dimension_numbers = #tpu.dot_dimension_numbers<[1], [0], [0], [1], [0, 0, 1, 1], [], []>} : vector<8x128xf32>, vector<128x128xf32>, vector<8x128xf32> -> vector<8x128xf32>
    %7 = arith.addf %3, %6 : vector<8x128xf32>
    %c0_6 = arith.constant 0 : index
    %c0_7 = arith.constant 0 : index
    %8 = vector.load %arg6[%c0_6, %c0_7] : memref<8x128xf32, #tpu.memory_space<vmem>>, vector<8x128xf32>
    tpu.vector_store %arg6[%c0_6, %c0_7], %7 {strides = array<i32>} : memref<8x128xf32, #tpu.memory_space<vmem>>, vector<8x128xf32>,
    %c0_i32_8 = arith.constant 0 : i32
    %9 = arith.cmpi eq, %arg2, %c0_i32_8 : i32
    %10 = arith.extui %9 : i1 to i32
    %c0_i32_9 = arith.constant 0 : i32
    %11 = arith.cmpi ne, %10, %c0_i32_9 : i32
    scf.if %11 {
      %c0_10 = arith.constant 0 : index
      %c0_11 = arith.constant 0 : index
      %12 = vector.load %arg6[%c0_10, %c0_11] : memref<8x128xf32, #tpu.memory_space<vmem>>, vector<8x128xf32>
      %c0_12 = arith.constant 0 : index
      %c0_13 = arith.constant 0 : index
      %13 = vector.load %arg5[%c0_12, %c0_13] : memref<1x128xf32, #tpu.memory_space<vmem>>, vector<1x128xf32>
      %14 = vector.broadcast %13 : vector<1x128xf32> to vector<8x128xf32>
      %15 = arith.addf %12, %14 : vector<8x128xf32>
      %c0_14 = arith.constant 0 : index
      %c0_15 = arith.constant 0 : index
      %16 = vector.load %arg6[%c0_14, %c0_15] : memref<8x128xf32, #tpu.memory_space<vmem>>, vector<8x128xf32>
      tpu.vector_store %arg6[%c0_14, %c0_15], %15 {strides = array<i32>} : memref<8x128xf32, #tpu.memory_space<vmem>>, vector<8x128xf32>,
    } else {
    }
    return
  }
  func.func @transform_0(%arg0: i32, %arg1: i32, %arg2: i32) -> (i32, i32) {
    %c0_i32 = arith.constant 0 : i32
    return %arg0, %arg2 : i32, i32
  }
  func.func @transform_1(%arg0: i32, %arg1: i32, %arg2: i32) -> (i32, i32) {
    %c0_i32 = arith.constant 0 : i32
    return %arg2, %arg1 : i32, i32
  }
  func.func @transform_2(%arg0: i32, %arg1: i32, %arg2: i32) -> (i32, i32) {
    %c0_i32 = arith.constant 0 : i32
    %c0_i32_0 = arith.constant 0 : i32
    return %c0_i32, %arg1 : i32, i32
  }
  func.func @transform_3(%arg0: i32, %arg1: i32, %arg2: i32) -> (i32, i32) {
    %c0_i32 = arith.constant 0 : i32
    return %arg0, %arg1 : i32, i32
  }
}

</mosaic_0001>

<bundles_post_ra>
// kernel: lr_forward.1
= control target key start
LH: loop header
LB: loop body
LE: loop exit
PB: predicated region body
PF: predicated region fallthrough
CT: control target
= control target key end

     0   :  { %v181_v0 = vmov 0.0   ;;  %vm182_vm0 = vmmov 0   ;;  %s260_s1 = inlined_call_operand.vmem [shape: f32[128,128], index: 1, kind: input, shape index: {}]   ;;  %s261_s0 = inlined_call_operand.vmem [shape: f32[8,128], index: 0, kind: input, shape index: {}]   ;;  %s262_s2 = inlined_call_operand.vmem [shape: f32[1,128], index: 2, kind: input, shape index: {}]   ;;  %s263_s3 = inlined_call_operand.vmem [shape: f32[8,128], index: 3, kind: output, shape index: {}]  }
   0x1   :  { %144 = vmatprep.subr.mxu0 %v181_v0  ;;  %v36_v1 = vld [vmem:[%s260_s1 + $0x78] sm:$0xff]  ;;  %v35_v2 = vld [vmem:[%s260_s1 + $0x70] sm:$0xff]  ;;  %176 = vmatprep.mubr.msk.f32.mxu0 %vm182_vm0, %v181_v0  ;;  %v34_v3 = vld [vmem:[%s260_s1 + $0x68] sm:$0xff] }
   0x2   :  { %145 = vmatpush3.msra.mxu0 %v36_v1  ;;  %v33_v4 = vld [vmem:[%s260_s1 + $0x60] sm:$0xff]  ;;  %v32_v5 = vld [vmem:[%s260_s1 + $0x58] sm:$0xff]  ;;  %v31_v6 = vld [vmem:[%s260_s1 + $0x50] sm:$0xff] }
   0x3   :  { %146 = vmatprep.subr.mxu0 %v181_v0  ;;  %v30_v7 = vld [vmem:[%s260_s1 + $0x48] sm:$0xff]  ;;  %v29_v8 = vld [vmem:[%s260_s1 + $0x40] sm:$0xff]  ;;  %v28_v9 = vld [vmem:[%s260_s1 + $0x38] sm:$0xff] }
   0x4   :  { %147 = vmatpush3.msra.mxu0 %v35_v2  ;;  %v27_v10 = vld [vmem:[%s260_s1 + $0x30] sm:$0xff]  ;;  %v26_v11 = vld [vmem:[%s260_s1 + $0x28] sm:$0xff]  ;;  %v25_v12 = vld [vmem:[%s260_s1 + $0x20] sm:$0xff] }
   0x5   :  { %148 = vmatprep.subr.mxu0 %v181_v0  ;;  %v24_v13 = vld [vmem:[%s260_s1 + $0x18] sm:$0xff]  ;;  %v23_v14 = vld [vmem:[%s260_s1 + $0x10] sm:$0xff]  ;;  %v22_v15 = vld [vmem:[%s260_s1 + $0x8] sm:$0xff] }
   0x6   :  { %149 = vmatpush3.msra.mxu0 %v34_v3  ;;  %v21_v16 = vld [vmem:[%s260_s1] sm:$0xff] }
   0x7   :  { %150 = vmatprep.subr.mxu0 %v181_v0  ;;  %v20_v17 = vld [vmem:[%s261_s0] sm:$0xff] }
   0x8   :  { %151 = vmatpush3.msra.mxu0 %v33_v4  ;;  %v126_v19 = vld [vmem:[%s262_s2] ss:$0 sm:$0xff] }
   0x9   :  { %152 = vmatprep.subr.mxu0 %v181_v0 }
   0xa   :  { %153 = vmatpush3.msra.mxu0 %v32_v5 }
   0xb   :  { %154 = vmatprep.subr.mxu0 %v181_v0 }
   0xc   :  { %155 = vmatpush3.msra.mxu0 %v31_v6 }
   0xd   :  { %156 = vmatprep.subr.mxu0 %v181_v0 }
   0xe   :  { %157 = vmatpush3.msra.mxu0 %v30_v7 }
   0xf   :  { %158 = vmatprep.subr.mxu0 %v181_v0 }
  0x10   :  { %159 = vmatpush3.msra.mxu0 %v29_v8 }
  0x11   :  { %160 = vmatprep.subr.mxu0 %v181_v0 }
  0x12   :  { %161 = vmatpush3.msra.mxu0 %v28_v9 }
  0x13   :  { %162 = vmatprep.subr.mxu0 %v181_v0 }
  0x14   :  { %163 = vmatpush3.msra.mxu0 %v27_v10 }
  0x15   :  { %164 = vmatprep.subr.mxu0 %v181_v0 }
  0x16   :  { %165 = vmatpush3.msra.mxu0 %v26_v11 }
  0x17   :  { %166 = vmatprep.subr.mxu0 %v181_v0 }
  0x18   :  { %167 = vmatpush3.msra.mxu0 %v25_v12 }
  0x19   :  { %168 = vmatprep.subr.mxu0 %v181_v0 }
  0x1a   :  { %169 = vmatpush3.msra.mxu0 %v24_v13 }
  0x1b   :  { %170 = vmatprep.subr.mxu0 %v181_v0 }
  0x1c   :  { %171 = vmatpush3.msra.mxu0 %v23_v14 }
  0x1d   :  { %172 = vmatprep.subr.mxu0 %v181_v0 }
  0x1e   :  { %173 = vmatpush3.msra.mxu0 %v22_v15 }
  0x1f   :  { %174 = vmatprep.subr.mxu0 %v181_v0 }
  0x20   :  { %175 = vmatpush3.msra.mxu0 %v21_v16 }
  0x21   :  { %177 = vmatmul.mubr.f32.vlgmr.msra.gmra.mxu0 %v20_v17 }
  0xe1   :  { %v103_v18 = vpop.f32.mrf.mxu0 }
  0xe2   :  { %v120_v21 = vadd.f32 %v126_v19, %v103_v18 }
  0xe3   :  { %v178_v20 = vpop.f32.mrf.mxu0 }
  0xe4   :  { %121 = vst [vmem:[%s263_s3] sm:$0xff] %v120_v21 }

</bundles_post_ra>
